<compile_context>
chip_gen: v5e
topology: v5e:2x2
jax: 0.10.0
libtpu: 0.0.40
codegen_flags: <defaults>
</compile_context>

<pallas_src>
import math

import jax
import jax.numpy as jnp
from jax import lax
from jax.experimental import pallas as pl
from jax.experimental.pallas import tpu as pltpu

_INV_SQRT2 = 1.0 / math.sqrt(2.0)


def _round_up(x, m):
    return ((x + m - 1) // m) * m


def _largest_divisor(n, cap, align=128):
    """Largest divisor of n that is <= cap, preferring multiples of `align`."""
    cap = max(1, min(cap, n))
    start = (cap // align) * align
    for c in range(start, 0, -align):
        if n % c == 0:
            return c
    for c in range(cap, 0, -1):
        if n % c == 0:
            return c
    return n


def _vmem_capacity_bytes():
    """Physical VMEM of the current chip; conservative (v7x) fallback."""
    try:
        return int(pltpu.get_tpu_info().vmem_capacity_bytes)
    except Exception:
        return 64 << 20


def _default_tiles(vmem_cap):
    # v5e/v6e (128 MiB VMEM): big token tile + big H chunk (fewer acc RMW passes).
    # v7x (64 MiB per TC): big token tile, moderate H chunk.
    if vmem_cap >= (100 << 20):
        return 1024, 1024
    if vmem_cap >= (48 << 20):
        return 1024, 512
    return 512, 512


def _working_set_bytes(tm, th, d, x_isz, w_isz, o_isz):
    w_chunks = 2 * 2 * d * th * w_isz          # W1 & W2 chunks, double-buffered
    biases = 2 * th * 4 + d * 4                # b1 chunks (x2) + b2 (single-buffered)
    xio = 2 * tm * d * (x_isz + o_isz)         # x / out tiles, double-buffered
    acc = tm * d * 4                           # f32 accumulator scratch
    h_live = 2 * tm * th * 4                   # live f32 h chunk + vreg-spill slack
    return w_chunks + biases + xio + acc + h_live


def _fit_tiles(tm, th, d, h_dim, x_isz, w_isz, o_isz, vmem_cap):
    """Shrink (tm, th) until the working set fits within ~75% of physical VMEM."""
    cap = int(vmem_cap * 0.75)
    while _working_set_bytes(tm, th, d, x_isz, w_isz, o_isz) > cap:
        if th >= tm and th > 128:
            th = _largest_divisor(h_dim, th // 2)
        elif tm > 128:
            tm = max(128, (tm // 2 // 8) * 8)
        elif th > 128:
            th = _largest_divisor(h_dim, th // 2)
        else:
            break
    return tm, th


def gpt2_mlp_kernel(x_ref, w1_ref, b1_ref, w2_ref, b2_ref, o_ref, acc_ref):
    j = pl.program_id(1)

    @pl.when(j == 0)
    def _():
        acc_ref[...] = jnp.zeros_like(acc_ref)

    # c_fc chunk: [tm, D] @ [D, th] -> [tm, th]  (MXU, f32 accumulation)
    h = jnp.dot(x_ref[...], w1_ref[...], preferred_element_type=jnp.float32)
    h = h + b1_ref[...]                       # (1, th) f32 bias broadcast

    # Exact GELU (torch nn.GELU() default, erf form) on the f32 chunk.
    # erf lands on the EUP slot, essentially free once the kernel is MXU-bound.
    h = 0.5 * h * (1.0 + lax.erf(h * _INV_SQRT2))

    # c_proj chunk: [tm, th] @ [th, D] -> accumulate into f32 VMEM scratch.
    acc_ref[...] += jnp.dot(h.astype(w2_ref.dtype), w2_ref[...],
                            preferred_element_type=jnp.float32)

    @pl.when(j == pl.num_programs(1) - 1)
    def _():
        o_ref[...] = (acc_ref[...] + b2_ref[...]).astype(o_ref.dtype)


def prepare_gpt2_mlp_params(w1, b1, w2, b2, compute_dtype=jnp.bfloat16):
    """Cast weights to the MXU compute dtype ONCE, outside the per-call hot path.

    Calling gpt2_mlp() with already-cast weights avoids a full extra HBM pass
    over the 8*D^2 weight elements on every forward call.
    """
    return (w1.astype(compute_dtype), b1.astype(jnp.float32),
            w2.astype(compute_dtype), b2.astype(jnp.float32))


def gpt2_mlp(x, w1, b1, w2, b2, *, tm=None, th=None, compute_dtype=jnp.bfloat16):
    """Fused GPT-2 MLP forward.

    x: [T, D]; w1: [D, H]; b1: [H]; w2: [H, D]; b2: [D]  (H = 4*D)  -> [T, D].
    Weights are stored transposed w.r.t. torch.nn.Linear ([in, out] layout).
    tm / th default to generation-aware values sized against physical VMEM
    (tm=1024 so the streamed W1/W2 chunks clear the v6e/v7x HBM ridge).
    """
    T, D = x.shape
    H = w1.shape[1]
    out_dtype = x.dtype
    if compute_dtype is None:
        compute_dtype = x.dtype

    # ---- generation-aware tile selection ---------------------------------
    vmem_cap = _vmem_capacity_bytes()
    tm_def, th_def = _default_tiles(vmem_cap)
    tm = tm_def if tm is None else tm
    th = th_def if th is None else th

    # Token tile: never larger than the (padded) token count; when T is big
    # enough, keep >= 2 token tiles so the "parallel" axis can span both
    # TensorCores on v7x instead of leaving one idle.
    tm_eff = min(tm, _round_up(T, 8))
    if T >= 512 and tm_eff >= T:
        tm_eff = min(tm_eff, _round_up((T + 1) // 2, 8))

    # Hidden chunk: must divide H.  Never fall back to the full H (that would
    # force W1/W2 fully VMEM-resident); use the largest divisor <= th instead.
    th_eff = _largest_divisor(H, th)

    x_isz = jnp.dtype(compute_dtype).itemsize
    o_isz = jnp.dtype(out_dtype).itemsize
    tm_eff, th_eff = _fit_tiles(tm_eff, th_eff, D, H, x_isz, x_isz, o_isz, vmem_cap)
    tm_eff = max(8, (tm_eff // 8) * 8)

    T_pad = _round_up(T, tm_eff)
    grid = (T_pad // tm_eff, H // th_eff)     # token axis parallel, H axis last

    # ---- dtype handling: bf16 operands for the MXU, f32 accumulation -----
    # Casts are conditional so pre-cast weights (prepare_gpt2_mlp_params) skip
    # the extra per-call HBM pass entirely.
    xc = x if x.dtype == compute_dtype else x.astype(compute_dtype)
    w1c = w1 if w1.dtype == compute_dtype else w1.astype(compute_dtype)
    w2c = w2 if w2.dtype == compute_dtype else w2.astype(compute_dtype)
    b1_2d = b1.reshape(1, H)
    b1_2d = b1_2d if b1_2d.dtype == jnp.float32 else b1_2d.astype(jnp.float32)
    b2_2d = b2.reshape(1, D)
    b2_2d = b2_2d if b2_2d.dtype == jnp.float32 else b2_2d.astype(jnp.float32)

    if T_pad != T:
        xc = jnp.pad(xc, ((0, T_pad - T), (0, 0)))

    # ---- VMEM budget: actual working set, clamped to the chip's capacity --
    need = _working_set_bytes(tm_eff, th_eff, D, x_isz, x_isz, o_isz)
    vmem_limit = int(min(max(need + (4 << 20), 16 << 20), int(vmem_cap * 0.85)))

    out = pl.pallas_call(
        gpt2_mlp_kernel,
        out_shape=jax.ShapeDtypeStruct((T_pad, D), out_dtype),
        grid=grid,
        in_specs=[
            pl.BlockSpec((tm_eff, D), lambda i, j: (i, 0)),     # x tile (reused over j)
            pl.BlockSpec((D, th_eff), lambda i, j: (0, j)),     # W1 column chunk
            pl.BlockSpec((1, th_eff), lambda i, j: (0, j)),     # b1 chunk
            pl.BlockSpec((th_eff, D), lambda i, j: (j, 0)),     # W2 row chunk
            # b2 is grid-invariant: single-buffer it to avoid a useless 2nd copy.
            pl.BlockSpec((1, D), lambda i, j: (0, 0),
                         pipeline_mode=pl.Buffered(1)),
        ],
        out_specs=pl.BlockSpec((tm_eff, D), lambda i, j: (i, 0)),
        scratch_shapes=[pltpu.VMEM((tm_eff, D), jnp.float32)],
        compiler_params=pltpu.CompilerParams(
            dimension_semantics=("parallel", "arbitrary"),
            vmem_limit_bytes=vmem_limit,
        ),
    )(xc, w1c, b1_2d, w2c, b2_2d)

    return out[:T] if T_pad != T else out


if __name__ == "__main__":
    key = jax.random.PRNGKey(0)
    key_a, key_b, key_c = jax.random.split(key, 3)

    def make_params(k, n_embd):
        hidden = 4 * n_embd
        k1, kb1, k2, kb2 = jax.random.split(k, 4)
        s_fc = 1.0 / math.sqrt(n_embd)
        s_pr = 1.0 / math.sqrt(hidden)
        w1 = jax.random.normal(k1, (n_embd, hidden), jnp.float32) * s_fc
        b1 = jax.random.normal(kb1, (hidden,), jnp.float32) * s_fc
        w2 = jax.random.normal(k2, (hidden, n_embd), jnp.float32) * s_pr
        b2 = jax.random.normal(kb2, (n_embd,), jnp.float32) * s_pr
        return w1, b1, w2, b2

    def reference(x2d, w1, b1, w2, b2):
        h = x2d @ w1 + b1
        h = 0.5 * h * (1.0 + lax.erf(h * _INV_SQRT2))
        return h @ w2 + b2

    # --- config 1: tiny toy shapes, pure f32 compute, strict check --------
    batch, seq, n_embd = 2, 8, 32                      # T=16, D=32, H=128
    kx, kp = jax.random.split(key_a)
    x = jax.random.normal(kx, (batch, seq, n_embd), jnp.float32)
    w1, b1, w2, b2 = make_params(kp, n_embd)
    x2d = x.reshape(batch * seq, n_embd)

    out = gpt2_mlp(x2d, w1, b1, w2, b2, compute_dtype=jnp.float32)
    jax.block_until_ready(out)
    ref = reference(x2d, w1, b1, w2, b2)
    assert jnp.allclose(out, ref, atol=1e-4, rtol=1e-4), "f32 mismatch vs reference"

    # --- config 2: bf16 MXU path, pre-cast weights, multi-step grid --------
    batch2, seq2, n_embd2 = 2, 256, 128                # T=512, D=128, H=512
    kx2, kp2 = jax.random.split(key_b)
    x2 = jax.random.normal(kx2, (batch2, seq2, n_embd2), jnp.float32)
    w1b, b1b, w2b, b2b = make_params(kp2, n_embd2)
    x2d2 = x2.reshape(batch2 * seq2, n_embd2)

    # Hoisted weight cast (done once, outside the per-call hot path).
    w1c, b1c, w2c, b2c = prepare_gpt2_mlp_params(w1b, b1b, w2b, b2b)
    # th=128 -> grid (2, 4): exercises both the parallel token split
    # (>=2 tiles for v7x megacore balance) and the H-chunked accumulation loop.
    out2 = gpt2_mlp(x2d2, w1c, b1c, w2c, b2c, th=128)
    jax.block_until_ready(out2)
    ref2 = reference(x2d2, w1b, b1b, w2b, b2b)
    assert jnp.allclose(out2, ref2, atol=5e-2, rtol=5e-2), "bf16 mismatch vs reference"

    # --- config 3: H % th != 0 -> divisor fallback (never full H) ----------
    batch3, seq3, n_embd3 = 2, 32, 192                 # T=64, D=192, H=768
    kx3, kp3 = jax.random.split(key_c)
    x3 = jax.random.normal(kx3, (batch3, seq3, n_embd3), jnp.float32)
    w1d, b1d, w2d, b2d = make_params(kp3, n_embd3)
    x2d3 = x3.reshape(batch3 * seq3, n_embd3)

    out3 = gpt2_mlp(x2d3, w1d, b1d, w2d, b2d, th=512)  # 768 % 512 != 0 -> th_eff=384
    jax.block_until_ready(out3)
    ref3 = reference(x2d3, w1d, b1d, w2d, b2d)
    assert jnp.allclose(out3, ref3, atol=5e-2, rtol=5e-2), "bf16 mismatch (th fallback)"

    print("KERNEL_OK")
</pallas_src>

<mosaic_0001>
module attributes {stable_mosaic.version = 11 : i64} {
  func.func @gpt2_mlp_kernel(%arg0: i32, %arg1: i32, %arg2: memref<16x32xf32, #tpu.memory_space<vmem>>, %arg3: memref<32x128xf32, #tpu.memory_space<vmem>>, %arg4: memref<1x128xf32, #tpu.memory_space<vmem>>, %arg5: memref<128x32xf32, #tpu.memory_space<vmem>>, %arg6: memref<1x32xf32, #tpu.memory_space<vmem>>, %arg7: memref<16x32xf32, #tpu.memory_space<vmem>>, %arg8: memref<16x32xf32, #tpu.memory_space<vmem>>) attributes {dimension_semantics = [#tpu.dimension_semantics<parallel>, #tpu.dimension_semantics<arbitrary>], iteration_bounds = array<i64: 1, 1>, scalar_prefetch = 0 : i64, scratch_operands = 1 : i64, tpu.core_type = #tpu.core_type<tc>, window_params = [{transform_indices = @transform_0, window_bounds = array<i64: 16, 32>}, {transform_indices = @transform_1, window_bounds = array<i64: 32, 128>}, {transform_indices = @transform_2, window_bounds = array<i64: 1, 128>}, {transform_indices = @transform_3, window_bounds = array<i64: 128, 32>}, {pipeline_mode = #tpu.pipeline_mode<synchronous>, transform_indices = @transform_4, window_bounds = array<i64: 1, 32>}, {transform_indices = @transform_5, window_bounds = array<i64: 16, 32>}]} {
    %c0_i32 = arith.constant 0 : i32
    %0 = arith.cmpi eq, %arg1, %c0_i32 : i32
    %1 = arith.extui %0 : i1 to i32
    %c0_i32_0 = arith.constant 0 : i32
    %2 = arith.cmpi ne, %1, %c0_i32_0 : i32
    scf.if %2 {
      %cst_18 = arith.constant 0.000000e+00 : f32
      %25 = vector.broadcast %cst_18 : f32 to vector<16x32xf32>
      %c0_19 = arith.constant 0 : index
      %c0_20 = arith.constant 0 : index
      %26 = vector.load %arg8[%c0_19, %c0_20] : memref<16x32xf32, #tpu.memory_space<vmem>>, vector<16x32xf32>
      tpu.vector_store %arg8[%c0_19, %c0_20], %25 {strides = array<i32>} : memref<16x32xf32, #tpu.memory_space<vmem>>, vector<16x32xf32>,
    } else {
    }
    %c0 = arith.constant 0 : index
    %c0_1 = arith.constant 0 : index
    %3 = vector.load %arg2[%c0, %c0_1] : memref<16x32xf32, #tpu.memory_space<vmem>>, vector<16x32xf32>
    %c0_2 = arith.constant 0 : index
    %c0_3 = arith.constant 0 : index
    %4 = vector.load %arg3[%c0_2, %c0_3] : memref<32x128xf32, #tpu.memory_space<vmem>>, vector<32x128xf32>
    %cst = arith.constant dense<0.000000e+00> : vector<16x128xf32>
    %5 = tpu.matmul %3, %4, %cst {dimension_numbers = #tpu.dot_dimension_numbers<[1], [0], [0], [1], [0, 0, 1, 1], [], []>} : vector<16x32xf32>, vector<32x128xf32>, vector<16x128xf32> -> vector<16x128xf32>
    %c0_4 = arith.constant 0 : index
    %c0_5 = arith.constant 0 : index
    %6 = vector.load %arg4[%c0_4, %c0_5] : memref<1x128xf32, #tpu.memory_space<vmem>>, vector<1x128xf32>
    %7 = vector.broadcast %6 : vector<1x128xf32> to vector<16x128xf32>
    %8 = arith.addf %5, %7 : vector<16x128xf32>
    %cst_6 = arith.constant 5.000000e-01 : f32
    %9 = vector.broadcast %cst_6 : f32 to vector<16x128xf32>
    %10 = arith.mulf %9, %8 : vector<16x128xf32>
    %cst_7 = arith.constant 0.707106769 : f32
    %11 = vector.broadcast %cst_7 : f32 to vector<16x128xf32>
    %12 = arith.mulf %8, %11 : vector<16x128xf32>
    %13 = math.erf %12 : vector<16x128xf32>
    %cst_8 = arith.constant 1.000000e+00 : f32
    %14 = vector.broadcast %cst_8 : f32 to vector<16x128xf32>
    %15 = arith.addf %14, %13 : vector<16x128xf32>
    %16 = arith.mulf %10, %15 : vector<16x128xf32>
    %c0_9 = arith.constant 0 : index
    %c0_10 = arith.constant 0 : index
    %17 = vector.load %arg8[%c0_9, %c0_10] : memref<16x32xf32, #tpu.memory_space<vmem>>, vector<16x32xf32>
    %c0_11 = arith.constant 0 : index
    %c0_12 = arith.constant 0 : index
    %18 = vector.load %arg5[%c0_11, %c0_12] : memref<128x32xf32, #tpu.memory_space<vmem>>, vector<128x32xf32>
    %cst_13 = arith.constant dense<0.000000e+00> : vector<16x32xf32>
    %19 = tpu.matmul %16, %18, %cst_13 {dimension_numbers = #tpu.dot_dimension_numbers<[1], [0], [0], [1], [0, 0, 1, 1], [], []>} : vector<16x128xf32>, vector<128x32xf32>, vector<16x32xf32> -> vector<16x32xf32>
    %20 = arith.addf %17, %19 : vector<16x32xf32>
    %c0_14 = arith.constant 0 : index
    %c0_15 = arith.constant 0 : index
    %21 = vector.load %arg8[%c0_14, %c0_15] : memref<16x32xf32, #tpu.memory_space<vmem>>, vector<16x32xf32>
    tpu.vector_store %arg8[%c0_14, %c0_15], %20 {strides = array<i32>} : memref<16x32xf32, #tpu.memory_space<vmem>>, vector<16x32xf32>,
    %c0_i32_16 = arith.constant 0 : i32
    %22 = arith.cmpi eq, %arg1, %c0_i32_16 : i32
    %23 = arith.extui %22 : i1 to i32
    %c0_i32_17 = arith.constant 0 : i32
    %24 = arith.cmpi ne, %23, %c0_i32_17 : i32
    scf.if %24 {
      %c0_18 = arith.constant 0 : index
      %c0_19 = arith.constant 0 : index
      %25 = vector.load %arg8[%c0_18, %c0_19] : memref<16x32xf32, #tpu.memory_space<vmem>>, vector<16x32xf32>
      %c0_20 = arith.constant 0 : index
      %c0_21 = arith.constant 0 : index
      %26 = vector.load %arg6[%c0_20, %c0_21] : memref<1x32xf32, #tpu.memory_space<vmem>>, vector<1x32xf32>
      %27 = vector.broadcast %26 : vector<1x32xf32> to vector<16x32xf32>
      %28 = arith.addf %25, %27 : vector<16x32xf32>
      %c0_22 = arith.constant 0 : index
      %c0_23 = arith.constant 0 : index
      %29 = vector.load %arg7[%c0_22, %c0_23] : memref<16x32xf32, #tpu.memory_space<vmem>>, vector<16x32xf32>
      tpu.vector_store %arg7[%c0_22, %c0_23], %28 {strides = array<i32>} : memref<16x32xf32, #tpu.memory_space<vmem>>, vector<16x32xf32>,
    } else {
    }
    return
  }
  func.func @transform_0(%arg0: i32, %arg1: i32) -> (i32, i32) {
    %c0_i32 = arith.constant 0 : i32
    %c0_i32_0 = arith.constant 0 : i32
    return %arg0, %c0_i32 : i32, i32
  }
  func.func @transform_1(%arg0: i32, %arg1: i32) -> (i32, i32) {
    %c0_i32 = arith.constant 0 : i32
    %c0_i32_0 = arith.constant 0 : i32
    return %c0_i32, %arg1 : i32, i32
  }
  func.func @transform_2(%arg0: i32, %arg1: i32) -> (i32, i32) {
    %c0_i32 = arith.constant 0 : i32
    %c0_i32_0 = arith.constant 0 : i32
    return %c0_i32, %arg1 : i32, i32
  }
  func.func @transform_3(%arg0: i32, %arg1: i32) -> (i32, i32) {
    %c0_i32 = arith.constant 0 : i32
    %c0_i32_0 = arith.constant 0 : i32
    return %arg1, %c0_i32 : i32, i32
  }
  func.func @transform_4(%arg0: i32, %arg1: i32) -> (i32, i32) {
    %c0_i32 = arith.constant 0 : i32
    %c0_i32_0 = arith.constant 0 : i32
    %c0_i32_1 = arith.constant 0 : i32
    return %c0_i32, %c0_i32_0 : i32, i32
  }
  func.func @transform_5(%arg0: i32, %arg1: i32) -> (i32, i32) {
    %c0_i32 = arith.constant 0 : i32
    %c0_i32_0 = arith.constant 0 : i32
    return %arg0, %c0_i32 : i32, i32
  }
}

</mosaic_0001>

<bundles_post_ra>
// kernel: tpu_custom_call.1
= control target key start
LH: loop header
LB: loop body
LE: loop exit
PB: predicated region body
PF: predicated region fallthrough
CT: control target
= control target key end

     0   :  { %s435_s0 = inlined_call_operand.vmem [shape: f32[16,32], index: 0, kind: input, shape index: {}]   ;;  %s436_s1 = inlined_call_operand.vmem [shape: f32[32,128], index: 1, kind: input, shape index: {}]   ;;  %s437_s2 = inlined_call_operand.vmem [shape: f32[1,128], index: 2, kind: input, shape index: {}]   ;;  %s438_s3 = inlined_call_operand.vmem [shape: f32[128,32], index: 3, kind: input, shape index: {}]   ;;  %s439_s4 = inlined_call_operand.vmem [shape: f32[1,32], index: 4, kind: input, shape index: {}]   ;;  %s440_s5 = inlined_call_operand.hbm [shape: f32[16,32], index: 5, kind: output, shape index: {}]  }
   0x1   :  { %v33_v0 = vld [vmem:[%s436_s1 + $0x18] sm:$0xff]  ;;  %v32_v1 = vld [vmem:[%s436_s1 + $0x10] sm:$0xff]  ;;  %v31_v2 = vld [vmem:[%s436_s1 + $0x8] sm:$0xff] }
   0x2   :  { %57 = vmatpush.msra.mxu0 %v33_v0 }
   0x3   :  { %10 = vsyncpa [#allocation4], 0  ;;  %v30_v3 = vld [vmem:[%s436_s1] sm:$0xff]  ;;  %vm25_vm0 = vcmask 261120   ;;  %v29_v5 = vld [vmem:[%s435_s0 + $0x8] sm:$0xff]  ;;  %v288_v0 = vmov 0.0  }
   0x4   :  { %58 = vmatpush.msra.mxu0 %v32_v1  ;;  %v28_v4 = vld [vmem:[%s435_s0] sm:$0xff]  ;;  %v173_v6 = vld [vmem:[%s438_s3 + $0x78] sm:$0xff]  ;;  %v172_v7 = vld [vmem:[%s438_s3 + $0x70] sm:$0xff]  ;;  %26 = vst.msk [vmem:[#allocation2] sm:$0xff] %vm25_vm0, %v288_v0  ;;  %s289_s10 = smov [#allocation3]   ;;  %s220_s14 = sshll.u32 %s440_s5, 4  ;;  %s221_s14 = int_to_ptr.hbm [resolvable:$true] %s220_s14 }
   0x5   :  { %174 = vmatpush.msra.mxu1 %v173_v6  ;;  %236 = vmatpush.msra.mxu2 %v173_v6  ;;  %v171_v8 = vld [vmem:[%s438_s3 + $0x68] sm:$0xff]  ;;  %v170_v9 = vld [vmem:[%s438_s3 + $0x60] sm:$0xff]  ;;  %v169_v11 = vld [vmem:[%s438_s3 + $0x58] sm:$0xff]  ;;  %27 = vst.msk [vmem:[#allocation2 + $0x8] sm:$0xff] %vm25_vm0, %v288_v0  ;;  %s218_s11 = sshll.u32 %s289_s10, 4  ;;  %s291_s15 = smov 8   ;;  %s219_s11 = int_to_ptr.vmem [resolvable:$true] %s218_s11 }
   0x6   :  { %59 = vmatpush.msra.mxu0 %v31_v2  ;;  %v256_v10 = vld [vmem:[%s437_s2] ss:$0 sm:$0xff]  ;;  %v168_v13 = vld [vmem:[%s438_s3 + $0x50] sm:$0xff]  ;;  %v167_v15 = vld [vmem:[%s438_s3 + $0x48] sm:$0xff] }
   0x7   :  { %175 = vmatpush.msra.mxu1 %v172_v7  ;;  %237 = vmatpush.msra.mxu2 %v172_v7  ;;  %v166_v17 = vld [vmem:[%s438_s3 + $0x40] sm:$0xff]  ;;  %v165_v19 = vld [vmem:[%s438_s3 + $0x38] sm:$0xff]  ;;  %v164_v20 = vld [vmem:[%s438_s3 + $0x30] sm:$0xff] }
   0x8   :  { %60 = vmatpush.msra.mxu0 %v30_v3  ;;  %v163_v23 = vld [vmem:[%s438_s3 + $0x28] sm:$0xff]  ;;  %v162_v27 = vld [vmem:[%s438_s3 + $0x20] sm:$0xff]  ;;  %v161_v30 = vld [vmem:[%s438_s3 + $0x18] sm:$0xff] }
   0x9   :  { %232 = vmatmul.msk.f32.vlgmr.msra.gmra.mxu0 %vm25_vm0, %v28_v4  ;;  %176 = vmatpush.msra.mxu1 %v171_v8  ;;  %v160_v34 = vld [vmem:[%s438_s3 + $0x10] sm:$0xff]  ;;  %v159_v37 = vld [vmem:[%s438_s3 + $0x8] sm:$0xff]  ;;  %v158_v42 = vld [vmem:[%s438_s3] sm:$0xff] }
   0xa   :  { %238 = vmatpush.msra.mxu2 %v171_v8 }
   0xb   :  { %177 = vmatpush.msra.mxu1 %v170_v9 }
   0xc   :  { %239 = vmatpush.msra.mxu2 %v170_v9 }
   0xd   :  { %178 = vmatpush.msra.mxu1 %v169_v11 }
   0xe   :  { %240 = vmatpush.msra.mxu2 %v169_v11 }
   0xf   :  { %179 = vmatpush.msra.mxu1 %v168_v13 }
  0x10   :  { %241 = vmatpush.msra.mxu2 %v168_v13 }
  0x11   :  { %233 = vmatmul.msk.f32.gmra.mxu0 %vm25_vm0, %v29_v5  ;;  %180 = vmatpush.msra.mxu1 %v167_v15 }
  0x12   :  { %242 = vmatpush.msra.mxu2 %v167_v15 }
  0x13   :  { %181 = vmatpush.msra.mxu1 %v166_v17 }
  0x14   :  { %243 = vmatpush.msra.mxu2 %v166_v17 }
  0x15   :  { %182 = vmatpush.msra.mxu1 %v165_v19 }
  0x16   :  { %244 = vmatpush.msra.mxu2 %v165_v19 }
  0x17   :  { %183 = vmatpush.msra.mxu1 %v164_v20 }
  0x18   :  { %245 = vmatpush.msra.mxu2 %v164_v20 }
  0x19   :  { %184 = vmatpush.msra.mxu1 %v163_v23 }
  0x1a   :  { %246 = vmatpush.msra.mxu2 %v163_v23 }
  0x1b   :  { %185 = vmatpush.msra.mxu1 %v162_v27 }
  0x1c   :  { %247 = vmatpush.msra.mxu2 %v162_v27 }
  0x1d   :  { %186 = vmatpush.msra.mxu1 %v161_v30 }
  0x1e   :  { %248 = vmatpush.msra.mxu2 %v161_v30 }
  0x1f   :  { %187 = vmatpush.msra.mxu1 %v160_v34 }
  0x20   :  { %249 = vmatpush.msra.mxu2 %v160_v34 }
  0x21   :  { %188 = vmatpush.msra.mxu1 %v159_v37 }
  0x22   :  { %250 = vmatpush.msra.mxu2 %v159_v37 }
  0x23   :  { %189 = vmatpush.msra.mxu1 %v158_v42 }
  0x24   :  { %251 = vmatpush.msra.mxu2 %v158_v42 }
  0x86   :  { %v62_v12 = vpop.f32.mrf.mxu0 }
  0x87   :  { %v363_v14 = vadd.f32 %v256_v10, %v62_v12 }
  0x89   :  { %v369_v16 = vmul.f32 0.70710677, %v363_v14  ;;  %v68_v34 = vmul.f32 0.5, %v363_v14 }
  0x8b   :  { %v72_v18 = vmul.f32 %v369_v16, %v369_v16 }
  0x8d   :  { %v382_v21 = vmin.f32 %v72_v18, 16.0 }
  0x8e   :  { %v65_v22 = vpop.f32.mrf.mxu0 }
  0x8f   :  { %v74_v24 = vmul.f32 2.1237322e-06, %v382_v21  ;;  %v388_v25 = vadd.f32 %v256_v10, %v65_v22  ;;  %v85_v26 = vmul.f32 3.8918573e-05, %v382_v21 }
  0x91   :  { %v75_v28 = vadd.f32 0.00028619796, %v74_v24  ;;  %v395_v29 = vmul.f32 0.70710677, %v388_v25  ;;  %v86_v31 = vadd.f32 0.001143296, %v85_v26 }
  0x92   :  { %v69_v42 = vmul.f32 0.5, %v388_v25 }
  0x93   :  { %v76_v32 = vmul.f32 %v75_v28, %v382_v21  ;;  %v112_v33 = vmul.f32 %v395_v29, %v395_v29  ;;  %v87_v35 = vmul.f32 %v86_v31, %v382_v21 }
  0x95   :  { %v113_v36 = vmin.f32 %v112_v33, 16.0  ;;  %v88_v38 = vadd.f32 0.014752088, %v87_v35  ;;  %v77_v39 = vadd.f32 0.0036580483, %v76_v32 }
  0x97   :  { %v114_v40 = vmul.f32 2.1237322e-06, %v113_v36  ;;  %v125_v41 = vmul.f32 3.8918573e-05, %v113_v36  ;;  %v89_v43 = vmul.f32 %v88_v38, %v382_v21  ;;  %v78_v47 = vmul.f32 %v77_v39, %v382_v21 }
  0x99   :  { %v115_v44 = vadd.f32 0.00028619796, %v114_v40  ;;  %v126_v45 = vadd.f32 0.001143296, %v125_v41  ;;  %v90_v46 = vadd.f32 0.112945676, %v89_v43 }
  0x9a   :  { %v79_v54 = vadd.f32 0.05243302, %v78_v47 }
  0x9b   :  { %v116_v48 = vmul.f32 %v115_v44, %v113_v36  ;;  %v127_v49 = vmul.f32 %v126_v45, %v113_v36  ;;  %v91_v50 = vmul.f32 %v90_v46, %v382_v21  ;;  %v156_v45 = vld [vmem:[#allocation2] sm:$0xff] }
  0x9c   :  { %v80_v60 = vmul.f32 %v79_v54, %v382_v21 }
  0x9d   :  { %v128_v51 = vadd.f32 0.014752088, %v127_v49  ;;  %v117_v52 = vadd.f32 0.0036580483, %v116_v48  ;;  %v92_v53 = vadd.f32 0.4994258, %v91_v50 }
  0x9e   :  { %v81_v1 = vadd.f32 0.18741608, %v80_v60  ;;  %v157_v48 = vld [vmem:[#allocation2 + $0x8] sm:$0xff] }
  0x9f   :  { %v129_v55 = vmul.f32 %v128_v51, %v113_v36  ;;  %v93_v56 = vmul.f32 %v92_v53, %v382_v21  ;;  %v118_v58 = vmul.f32 %v117_v52, %v113_v36 }
  0xa0   :  { %v82_v6 = vmul.f32 %v81_v1, %v382_v21 }
  0xa1   :  { %v130_v57 = vadd.f32 0.112945676, %v129_v55  ;;  %v94_v59 = vadd.f32 1.0, %v93_v56  ;;  %v119_v63 = vadd.f32 0.05243302, %v118_v58 }
  0xa2   :  { %v83_v11 = vadd.f32 1.1283791, %v82_v6 }
  0xa3   :  { %v131_v61 = vmul.f32 %v130_v57, %v113_v36  ;;  %258 = vrcp.f32 %v94_v59  ;;  %v120_v5 = vmul.f32 %v119_v63, %v113_v36  ;;  %v106_v10 = vand.u32 2147483648, %v94_v59 }
  0xa4   :  { %v104_v13 = vand.u32 2147483647, %v94_v59  ;;  %vm100_vm2 = vweird.f32 %v94_v59  ;;  %v84_v22 = vmul.f32 %v83_v11, %v369_v16 }
  0xa5   :  { %v132_v62 = vadd.f32 0.4994258, %v131_v61  ;;  %v121_v9 = vadd.f32 0.18741608, %v120_v5  ;;  %v107_v19 = vor.u32 1.1754944e-38, %v106_v10 }
  0xa6   :  { %vm105_vm4 = vcmp.eq.f32.partialorder %v104_v13, 8.507059e+37 }
  0xa7   :  { %v133_v2 = vmul.f32 %v132_v62, %v113_v36  ;;  %v122_v18 = vmul.f32 %v121_v9, %v113_v36 }
  0xa9   :  { %v134_v3 = vadd.f32 1.0, %v133_v2  ;;  %v259_v4 = vpop.eup %258  ;;  %v123_v28 = vadd.f32 1.1283791, %v122_v18 }
  0xaa   :  { %v96_v7 = vmul.f32 %v259_v4, %v94_v59  ;;  %vm101_vm1 = vweird.f32 %v259_v4 }
  0xab   :  { %260 = vrcp.f32 %v134_v3  ;;  %vm102_vm3 = vmor %vm100_vm2, %vm101_vm1  ;;  %v146_v27 = vand.u32 2147483648, %v134_v3  ;;  %v144_v31 = vand.u32 2147483647, %v134_v3  ;;  %vm140_vm6 = vweird.f32 %v134_v3 }
  0xac   :  { %v97_v8 = vsub.f32 1.0, %v96_v7  ;;  %v124_v16 = vmul.f32 %v123_v28, %v395_v29  ;;  %v257_v29 = vld [vmem:[%s439_s4] ss:$0 sm:$0xff]  ;;  %s290_s4 = smov 128  }
  0xad   :  { %v147_v36 = vor.u32 1.1754944e-38, %v146_v27  ;;  %vm145_vm8 = vcmp.eq.f32.partialorder %v144_v31, 8.507059e+37 }
  0xae   :  { %v98_v12 = vmul.f32 %v259_v4, %v97_v8 }
  0xb0   :  { %v99_v17 = vadd.f32 %v259_v4, %v98_v12 }
  0xb1   :  { %v261_v15 = vpop.eup %260 }
  0xb2   :  { %v136_v20 = vmul.f32 %v261_v15, %v134_v3  ;;  %v103_v23 = vsel %vm102_vm3, %v259_v4, %v99_v17  ;;  %vm141_vm5 = vweird.f32 %v261_v15 }
  0xb3   :  { %v108_v21 = vsel %vm105_vm4, %v107_v19, %v103_v23  ;;  %vm142_vm7 = vmor %vm140_vm6, %vm141_vm5 }
  0xb4   :  { %v137_v24 = vsub.f32 1.0, %v136_v20  ;;  %v109_v26 = vmul.f32 %v108_v21, %v84_v22 }
  0xb6   :  { %v138_v30 = vmul.f32 %v261_v15, %v137_v24  ;;  %v234_v32 = vclamps-f32 %v109_v26, 1.0 }
  0xb8   :  { %v139_v33 = vadd.f32 %v261_v15, %v138_v30  ;;  %v152_v35 = vadd.f32 1.0, %v234_v32 }
  0xba   :  { %v143_v37 = vsel %vm142_vm7, %v261_v15, %v139_v33  ;;  %v154_v38 = vmul.f32 %v152_v35, %v68_v34 }
  0xbb   :  { %v148_v39 = vsel %vm145_vm8, %v147_v36, %v143_v37 }
  0xbc   :  { %v149_v40 = vmul.f32 %v148_v39, %v124_v16  ;;  %190 = vmatmul.f32.vlgmr.msra.gmra.mxu1 %v154_v38 }
  0xbe   :  { %v235_v41 = vclamps-f32 %v149_v40, 1.0 }
  0xc0   :  { %v153_v43 = vadd.f32 1.0, %v235_v41 }
  0xc2   :  { %v155_v44 = vmul.f32 %v153_v43, %v69_v42 }
  0xc4   :  { %193 = vmatmul.f32.vlgmr.msra.gmra.mxu2 %v155_v44 }
 0x139   :  { %v191_v46 = vpop.f32.mrf.mxu1 }
 0x13a   :  { %v197_v14 = vadd.f32 %v191_v46, %v156_v45 }
 0x13c   :  { %199 = vst.msk [vmem:[#allocation2] sm:$0xff] %vm25_vm0, %v197_v14 }
 0x143   :  { %v204_v47 = vld [vmem:[#allocation2] sm:$0xff] }
 0x144   :  { %v210_v49 = vadd.f32 %v257_v29, %v204_v47 }
 0x146   :  { %212 = vst.msk [vmem:[#allocation3] sm:$0xff] %vm25_vm0, %v210_v49 }
 0x147   :  { %v194_v50 = vpop.f32.mrf.mxu2 }
 0x148   :  { %v198_v51 = vadd.f32 %v194_v50, %v157_v48 }
 0x14a   :  { %200 = vst.msk [vmem:[#allocation2 + $0x8] sm:$0xff] %vm25_vm0, %v198_v51 }
 0x151   :  { %v205_v25 = vld [vmem:[#allocation2 + $0x8] sm:$0xff] }
 0x152   :  { %v211_v52 = vadd.f32 %v257_v29, %v205_v25 }
 0x154   :  { %213 = vst.msk [vmem:[#allocation3 + $0x8] sm:$0xff] %vm25_vm0, %v211_v52 }
 0x155   :  { %226 = dma.vmem_to_hbm [thread:$0]  %s219_s11, 256, %s221_s14, [#allocation4], %s290_s4, %s290_s4, %s291_s15  }
 0x156   :  { %286 = dma.done.wait [#allocation4], 256  }
 0x157   :  { %287 = vsyncadd [#allocation4], 4294967040 }
 0x158   :  { %231 = vsyncpa [#allocation4], 1 }

</bundles_post_ra>
